<compile_context>
chip_gen: v6e
topology: v6e:2x2x1
jax: 0.10.0
libtpu: 0.0.40
codegen_flags: <defaults>
</compile_context>

<pallas_src>
import numpy as np
import jax
import jax.numpy as jnp
from jax import lax
from jax.experimental import pallas as pl
from jax.experimental.pallas import tpu as pltpu


# ---------------------------------------------------------------------------
# Compile-time helpers (numpy, parameter-sized work only).
# ---------------------------------------------------------------------------
def _interp_matrix(in_size, out_size):
    """(out_size, in_size) 1-D linear interpolation matrix, align_corners=True."""
    if in_size == 1:
        return np.ones((out_size, 1), np.float32)
    coords = np.arange(out_size, dtype=np.float64) * (in_size - 1) / (out_size - 1)
    lo = np.clip(np.floor(coords).astype(np.int64), 0, in_size - 1)
    hi = np.clip(lo + 1, 0, in_size - 1)
    frac = (coords - lo).astype(np.float32)
    m = np.zeros((out_size, in_size), np.float32)
    m[np.arange(out_size), lo] += 1.0 - frac
    m[np.arange(out_size), hi] += frac
    return m


def _shifted_interp(in_size, out_size):
    """A[k, o, i] = Mpad[o + k, i] for k = 0..2, where Mpad is the interpolation matrix
    with a zero row prepended/appended (the conv's zero padding on the upsampled axis)."""
    m = _interp_matrix(in_size, out_size)
    mpad = np.zeros((out_size + 2, in_size), np.float32)
    mpad[1:out_size + 1] = m
    return np.stack([mpad[k:k + out_size] for k in range(3)], axis=0)


def _depth_tap_matrix(d, do, bb):
    """(3*bb*Do, bb*D) block matrix: row (kd, b, do) applies the kd-shifted, zero-padded
    align-corners depth interpolation to batch element b (block-diagonal over b)."""
    ad = _shifted_interp(d, do)                      # (3, Do, D)
    m = np.zeros((3, bb, do, bb, d), np.float32)
    for b in range(bb):
        m[:, b, :, b, :] = ad
    return m.reshape(3 * bb * do, bb * d)


def _pick_batch_block(n, d, do, target_rows=256):
    """Largest divisor bb of n with bb*Do <= target_rows, keeping the flattened
    (rows = batch*depth) blocks legal w.r.t. the (8, 128) tiling rule."""
    candidates = [c for c in range(1, n + 1) if n % c == 0]
    legal = [c for c in candidates
             if c == n or ((c * d) % 8 == 0 and (c * do) % 8 == 0)]
    under = [c for c in legal if c * do <= target_rows]
    return max(under) if under else min(legal)


# ---------------------------------------------------------------------------
# Pallas kernel: fused (upsample + pad + conv3d + bias + ReLU) per batch block.
# ---------------------------------------------------------------------------
def _fused_up_conv_relu_kernel(x_ref, w_ref, md_ref, b_ref, o_ref):
    # x_ref : (bb*D,      H*W*Cin)      bf16  rows (b, d), cols (h, w, ci)
    # w_ref : (3*H*W*Cin, Cout*Ho*Wo)   bf16  rows (kd, h, w, ci), cols (co, ho, wo)
    # md_ref: (3*bb*Do,   bb*D)         bf16  block-diag shifted depth-interp taps
    # b_ref : (1, Cout*Ho*Wo)           f32   bias repeated over (ho, wo)
    # o_ref : (bb*Do, Cout*Ho*Wo)       f32   lane-dense output slab
    m_rows = o_ref.shape[0]                                    # bb*Do

    # Depth interpolation + zero padding + all three kd taps in ONE small matmul.
    xd = jnp.dot(md_ref[...], x_ref[...], preferred_element_type=jnp.float32)
    xd = xd.astype(jnp.bfloat16)                               # (3*bb*Do, H*W*Cin)

    # Move kd from rows to the lane axis -> single K = 3*H*W*Cin contraction.
    xd3 = jnp.concatenate(
        [xd[k * m_rows:(k + 1) * m_rows, :] for k in range(3)], axis=-1)

    acc = jnp.dot(xd3, w_ref[...], preferred_element_type=jnp.float32)
    o_ref[...] = jnp.maximum(acc + b_ref[...], 0.0).astype(o_ref.dtype)


# ---------------------------------------------------------------------------
# Full module forward (mode_upsampling=1, normalization='none').
# ---------------------------------------------------------------------------
def upsampling_function_forward(x_ncdhw, weight, bias, stride=2):
    """x: (N, Cin, D, H, W) -> (N, Cout, D*stride, H*stride, W*stride).

    weight: (3, 3, 3, Cin, Cout)  [kd, kh, kw, ci, co]   (Conv3d k=3, padding=1)
    bias  : (Cout,)
    """
    n, cin, d, h, w = x_ncdhw.shape
    kd_, kh_, kw_, wcin, cout = weight.shape
    assert (kd_, kh_, kw_) == (3, 3, 3) and wcin == cin
    do, ho, wo = d * stride, h * stride, w * stride
    k_in = h * w * cin
    n_out = cout * ho * wo

    bb = _pick_batch_block(n, d, do)
    grid = (n // bb,)

    # --- fold the tiny parameter tensors once ---
    ah = jnp.asarray(_shifted_interp(h, ho))    # (3, Ho, H)
    aw = jnp.asarray(_shifted_interp(w, wo))    # (3, Wo, W)
    # wbig[(kd, h, w, ci), (co, ho, wo)] = sum_{kh, kw} weight * Ah[kh] * Aw[kw]
    wbig = jnp.einsum('dabio,ayh,bxw->dhwioyx', weight.astype(jnp.float32), ah, aw)
    wbig = wbig.reshape(3 * k_in, n_out).astype(jnp.bfloat16)
    md = jnp.asarray(_depth_tap_matrix(d, do, bb)).astype(jnp.bfloat16)
    btile = jnp.repeat(bias.astype(jnp.float32), ho * wo).reshape(1, n_out)

    # Small input relayout (stride^3 smaller than the output tensor).
    x2 = jnp.transpose(x_ncdhw, (0, 2, 3, 4, 1)).reshape(n * d, k_in)
    x2 = x2.astype(jnp.bfloat16)

    out = pl.pallas_call(
        _fused_up_conv_relu_kernel,
        out_shape=jax.ShapeDtypeStruct((n * do, n_out), jnp.float32),
        grid_spec=pltpu.PrefetchScalarGridSpec(
            num_scalar_prefetch=0,
            grid=grid,
            in_specs=[
                pl.BlockSpec((bb * d, k_in), lambda i: (i, 0)),
                pl.BlockSpec((3 * k_in, n_out), lambda i: (0, 0)),
                pl.BlockSpec((3 * bb * do, bb * d), lambda i: (0, 0)),
                pl.BlockSpec((1, n_out), lambda i: (0, 0)),
            ],
            out_specs=pl.BlockSpec((bb * do, n_out), lambda i: (i, 0)),
        ),
        compiler_params=pltpu.CompilerParams(
            dimension_semantics=("parallel",),
            vmem_limit_bytes=32 * 1024 * 1024,
        ),
    )(x2, wbig, md, btile)

    # (N*Do, Cout*Ho*Wo) -> (N, Cout, Do, Ho, Wo).  Columns are co-major, so this
    # permutation only swaps outer dims over contiguous (Ho, Wo) runs.
    out = out.reshape(n, do, cout, ho, wo)
    return jnp.transpose(out, (0, 2, 1, 3, 4))


# ---------------------------------------------------------------------------
# Pure-JAX reference (trilinear upsample + lax.conv) for the correctness check.
# ---------------------------------------------------------------------------
def _upsample1d_align_corners(x, axis, out_size):
    in_size = x.shape[axis]
    if in_size == 1:
        coords = jnp.zeros((out_size,), jnp.float32)
    else:
        coords = jnp.arange(out_size, dtype=jnp.float32) * (in_size - 1) / (out_size - 1)
    lo = jnp.clip(jnp.floor(coords).astype(jnp.int32), 0, in_size - 1)
    hi = jnp.clip(lo + 1, 0, in_size - 1)
    frac = coords - lo.astype(jnp.float32)
    x_lo = jnp.take(x, lo, axis=axis)
    x_hi = jnp.take(x, hi, axis=axis)
    bshape = [1] * x.ndim
    bshape[axis] = out_size
    frac = frac.reshape(bshape)
    return x_lo * (1.0 - frac) + x_hi * frac


def trilinear_upsample_align_corners(x_ncdhw, scale=2):
    y = _upsample1d_align_corners(x_ncdhw, 2, x_ncdhw.shape[2] * scale)
    y = _upsample1d_align_corners(y, 3, x_ncdhw.shape[3] * scale)
    y = _upsample1d_align_corners(y, 4, x_ncdhw.shape[4] * scale)
    return y


def reference_forward(x_ncdhw, weight, bias, stride=2):
    x_up = trilinear_upsample_align_corners(x_ncdhw.astype(jnp.float32), scale=stride)
    w_oidhw = jnp.transpose(weight, (4, 3, 0, 1, 2))
    y = lax.conv_general_dilated(
        x_up, w_oidhw,
        window_strides=(1, 1, 1),
        padding=((1, 1), (1, 1), (1, 1)),
        dimension_numbers=("NCDHW", "OIDHW", "NCDHW"),
    )
    y = y + bias.reshape(1, -1, 1, 1, 1)
    return jnp.maximum(y, 0.0)


if __name__ == "__main__":
    key = jax.random.PRNGKey(0)
    k_x, k_w, k_b = jax.random.split(key, 3)

    N, Cin, Cout = 2, 4, 8
    D = H = W = 4
    stride = 2

    x = jax.random.normal(k_x, (N, Cin, D, H, W), dtype=jnp.float32)
    fan_in = Cin * 27
    bound = 1.0 / (fan_in ** 0.5)
    weight = jax.random.uniform(k_w, (3, 3, 3, Cin, Cout), jnp.float32, -bound, bound)
    bias = jax.random.uniform(k_b, (Cout,), jnp.float32, -bound, bound)

    y = upsampling_function_forward(x, weight, bias, stride=stride)
    y = jax.block_until_ready(y)

    y_ref = reference_forward(x, weight, bias, stride=stride)
    assert y.shape == (N, Cout, D * stride, H * stride, W * stride), y.shape
    err = float(jnp.max(jnp.abs(y - y_ref)))
    # bf16 operands / f32 accumulation: tolerance loosened vs. the pure-f32 version.
    assert jnp.allclose(y, y_ref, atol=3e-2, rtol=3e-2), err

    print("KERNEL_OK")
</pallas_src>

<mosaic_0001>
module attributes {stable_mosaic.version = 11 : i64} {
  func.func @_fused_up_conv_relu_kernel(%arg0: i32, %arg1: memref<8x64xbf16, #tpu.memory_space<vmem>>, %arg2: memref<192x512xbf16, #tpu.memory_space<vmem>>, %arg3: memref<48x8xbf16, #tpu.memory_space<vmem>>, %arg4: memref<1x512xf32, #tpu.memory_space<vmem>>, %arg5: memref<16x512xf32, #tpu.memory_space<vmem>>) attributes {dimension_semantics = [#tpu.dimension_semantics<parallel>], iteration_bounds = array<i64: 1>, scalar_prefetch = 0 : i64, scratch_operands = 0 : i64, tpu.core_type = #tpu.core_type<tc>, window_params = [{transform_indices = @transform_0, window_bounds = array<i64: 8, 64>}, {pipeline_mode = #tpu.pipeline_mode<synchronous>, transform_indices = @transform_1, window_bounds = array<i64: 192, 512>}, {pipeline_mode = #tpu.pipeline_mode<synchronous>, transform_indices = @transform_2, window_bounds = array<i64: 48, 8>}, {pipeline_mode = #tpu.pipeline_mode<synchronous>, transform_indices = @transform_3, window_bounds = array<i64: 1, 512>}, {transform_indices = @transform_4, window_bounds = array<i64: 16, 512>}]} {
    %c0 = arith.constant 0 : index
    %c0_0 = arith.constant 0 : index
    %0 = vector.load %arg3[%c0, %c0_0] : memref<48x8xbf16, #tpu.memory_space<vmem>>, vector<48x8xbf16>
    %c0_1 = arith.constant 0 : index
    %c0_2 = arith.constant 0 : index
    %1 = vector.load %arg1[%c0_1, %c0_2] : memref<8x64xbf16, #tpu.memory_space<vmem>>, vector<8x64xbf16>
    %cst = arith.constant dense<0.000000e+00> : vector<48x64xf32>
    %2 = tpu.matmul %0, %1, %cst {dimension_numbers = #tpu.dot_dimension_numbers<[1], [0], [0], [1], [0, 0, 1, 1], [], []>} : vector<48x8xbf16>, vector<8x64xbf16>, vector<48x64xf32> -> vector<48x64xf32>
    %3 = arith.truncf %2 : vector<48x64xf32> to vector<48x64xbf16>
    %4 = vector.extract_strided_slice %3 {offsets = [0, 0], sizes = [16, 64], strides = [1, 1]} : vector<48x64xbf16> to vector<16x64xbf16>
    %5 = vector.extract_strided_slice %3 {offsets = [16, 0], sizes = [16, 64], strides = [1, 1]} : vector<48x64xbf16> to vector<16x64xbf16>
    %6 = vector.extract_strided_slice %3 {offsets = [32, 0], sizes = [16, 64], strides = [1, 1]} : vector<48x64xbf16> to vector<16x64xbf16>
    %7 = tpu.concatenate %4, %5, %6 in 1 : vector<16x64xbf16>, vector<16x64xbf16>, vector<16x64xbf16> -> vector<16x192xbf16>
    %c0_3 = arith.constant 0 : index
    %c0_4 = arith.constant 0 : index
    %8 = vector.load %arg2[%c0_3, %c0_4] : memref<192x512xbf16, #tpu.memory_space<vmem>>, vector<192x512xbf16>
    %cst_5 = arith.constant dense<0.000000e+00> : vector<16x512xf32>
    %9 = tpu.matmul %7, %8, %cst_5 {dimension_numbers = #tpu.dot_dimension_numbers<[1], [0], [0], [1], [0, 0, 1, 1], [], []>} : vector<16x192xbf16>, vector<192x512xbf16>, vector<16x512xf32> -> vector<16x512xf32>
    %c0_6 = arith.constant 0 : index
    %c0_7 = arith.constant 0 : index
    %10 = vector.load %arg4[%c0_6, %c0_7] : memref<1x512xf32, #tpu.memory_space<vmem>>, vector<1x512xf32>
    %11 = vector.broadcast %10 : vector<1x512xf32> to vector<16x512xf32>
    %12 = arith.addf %9, %11 : vector<16x512xf32>
    %cst_8 = arith.constant 0.000000e+00 : f32
    %13 = vector.broadcast %cst_8 : f32 to vector<16x512xf32>
    %14 = arith.maximumf %12, %13 : vector<16x512xf32>
    %c0_9 = arith.constant 0 : index
    %c0_10 = arith.constant 0 : index
    %15 = vector.load %arg5[%c0_9, %c0_10] : memref<16x512xf32, #tpu.memory_space<vmem>>, vector<16x512xf32>
    tpu.vector_store %arg5[%c0_9, %c0_10], %14 {strides = array<i32>} : memref<16x512xf32, #tpu.memory_space<vmem>>, vector<16x512xf32>,
    return
  }
  func.func @transform_0(%arg0: i32) -> (i32, i32) {
    %c0_i32 = arith.constant 0 : i32
    %c0_i32_0 = arith.constant 0 : i32
    return %arg0, %c0_i32 : i32, i32
  }
  func.func @transform_1(%arg0: i32) -> (i32, i32) {
    %c0_i32 = arith.constant 0 : i32
    %c0_i32_0 = arith.constant 0 : i32
    %c0_i32_1 = arith.constant 0 : i32
    return %c0_i32, %c0_i32_0 : i32, i32
  }
  func.func @transform_2(%arg0: i32) -> (i32, i32) {
    %c0_i32 = arith.constant 0 : i32
    %c0_i32_0 = arith.constant 0 : i32
    %c0_i32_1 = arith.constant 0 : i32
    return %c0_i32, %c0_i32_0 : i32, i32
  }
  func.func @transform_3(%arg0: i32) -> (i32, i32) {
    %c0_i32 = arith.constant 0 : i32
    %c0_i32_0 = arith.constant 0 : i32
    %c0_i32_1 = arith.constant 0 : i32
    return %c0_i32, %c0_i32_0 : i32, i32
  }
  func.func @transform_4(%arg0: i32) -> (i32, i32) {
    %c0_i32 = arith.constant 0 : i32
    %c0_i32_0 = arith.constant 0 : i32
    return %arg0, %c0_i32 : i32, i32
  }
}

</mosaic_0001>

<bundles_post_ra>
// kernel: tpu_custom_call.1
= control target key start
LH: loop header
LB: loop body
LE: loop exit
PB: predicated region body
PF: predicated region fallthrough
CT: control target
= control target key end

     0   :  { %9 = vsyncpa [#allocation3], 0  ;;  %s826_s0 = inlined_call_operand.vmem [shape: bf16[8,64], index: 0, kind: input, shape index: {}]   ;;  %s827_s1 = inlined_call_operand.hbm [shape: bf16[192,512], index: 1, kind: input, shape index: {}]   ;;  %s828_s2 = inlined_call_operand.vmem [shape: bf16[48,8], index: 2, kind: input, shape index: {}]   ;;  %s829_s3 = inlined_call_operand.vmem [shape: f32[1,512], index: 3, kind: input, shape index: {}]   ;;  %s830_s4 = inlined_call_operand.hbm [shape: f32[16,512], index: 4, kind: output, shape index: {}]  }
   0x1   :  { %10 = vsyncpa [#allocation4], 0  ;;  %s771_s15 = smov [#allocation2]  }
   0x2   :  { %s18_s16 = sshll.u32 %s771_s15, 4  ;;  %s19_s16 = int_to_ptr.vmem [resolvable:$true] %s18_s16 }
   0x3   :  { %s735_s17 = scalar_lea.vmem %s19_s16, 6144  ;;  %p740_p1 = scmp.lt.s32.totalorder %s19_s16, %s19_s16 }
   0x4   :  { %p736_p0 = scmp.ne.s32.totalorder %s19_s16, %s735_s17  ;;  %p741_p2 = scmp.lt.s32.totalorder %s735_s17, %s735_s17 }
   0x6   :  { %p742_p3 = por %p741_p2, %p740_p1 }
   0x8   :  { %p743_p4 = pnand %p742_p3, %p736_p0 }
   0xa   :  { %746 = shalt.err (!%p743_p4)
}
   0xb   :  { %s772_s18 = smov 256   ;;  %s773_s19 = smov 16  }
   0xc   :  { %24 = dma.hbm_to_vmem [thread:$0]  %s827_s1, 6144, %s19_s16, [#allocation3], %s772_s18, %s772_s18, %s773_s19  }
   0xd   :  { %767 = dma.done.wait [#allocation3], 6144  }
   0xe   :  { %768 = vsyncadd [#allocation3], 4294961152  ;;  %v774_v0 = vmov 0.0   ;;  %vm775_vm0 = vmmov 0   ;;  %vm65_vm1 = vcmask 1043456   ;;  %v652_v3 = vld [vmem:[%s828_s2] sm:$0xff]  }
   0xf   :  { %629 = vmatprep.subr.bf16.mxu0 %v774_v0  ;;  %631 = vmatprep.mubr.msk.bf16.mxu0 %vm775_vm0, %v774_v0  ;;  %v39_v1 = vld [vmem:[%s826_s0] sm:$0xf]  ;;  %vm55_vm2 = vcmask 64512   ;;  %v653_v4 = vld [vmem:[%s828_s2 + $0x8] sm:$0xff]   ;;  %v654_v5 = vld [vmem:[%s828_s2 + $0x10] sm:$0xff]   ;;  %s776_s0 = smov 64  }
  0x10   :  { %v67_v2 = vsel %vm65_vm1, %v39_v1, 0  ;;  %v655_v6 = vld [vmem:[#allocation2 + $0xe4] ss:$16 sps:$4 sm:$0xff]   ;;  %v657_v7 = vld [vmem:[#allocation2 + $0xe8] ss:$16 sps:$4 sm:$0xff]   ;;  %vm132_vm3 = vcmask 523264  }
  0x11   :  { %630 = vmatpush3.bf16.msra.mxu0 %v67_v2  ;;  %v659_v8 = vld [vmem:[#allocation2 + $0xec] ss:$16 sps:$4 sm:$0xff]   ;;  %v660_v9 = vld [vmem:[#allocation2 + $0xe0] ss:$16 sps:$4 sm:$0xff]   ;;  %v661_v10 = vld [vmem:[#allocation2 + $0xc4] ss:$16 sps:$4 sm:$0xff]   ;;  %450 = vmatprep.subr.bf16.mxu1 %v655_v6 }
  0x12   :  { %493 = vmatprep.subr.bf16.mxu0 %v659_v8  ;;  %v665_v11 = vld [vmem:[#allocation2 + $0xcc] ss:$16 sps:$4 sm:$0xff]   ;;  %451 = vmatpush1.bf16.msra.mxu1 %v660_v9  ;;  %v663_v12 = vld [vmem:[#allocation2 + $0xc8] ss:$16 sps:$4 sm:$0xff]   ;;  %v666_v13 = vld [vmem:[#allocation2 + $0xc0] ss:$16 sps:$4 sm:$0xff]  }
  0x13   :  { %452 = vmatprep.subr.bf16.mxu1 %v661_v10  ;;  %v667_v14 = vld [vmem:[#allocation2 + $0xa4] ss:$16 sps:$4 sm:$0xff]   ;;  %v671_v15 = vld [vmem:[#allocation2 + $0xac] ss:$16 sps:$4 sm:$0xff]   ;;  %v669_v16 = vld [vmem:[#allocation2 + $0xa8] ss:$16 sps:$4 sm:$0xff]  }
  0x14   :  { %632 = vmatmul.mubr.msk.bf16.vlgmr.msra.gmra.mxu0 %vm55_vm2, %v652_v3  ;;  %v672_v17 = vld [vmem:[#allocation2 + $0xa0] ss:$16 sps:$4 sm:$0xff]   ;;  %v673_v18 = vld [vmem:[#allocation2 + $0x84] ss:$16 sps:$4 sm:$0xff]   ;;  %v677_v19 = vld [vmem:[#allocation2 + $0x8c] ss:$16 sps:$4 sm:$0xff]  }
  0x15   :  { %635 = vmatprep.mubr.msk.bf16.mxu0 %vm775_vm0, %v774_v0  ;;  %494 = vmatpush1.bf16.msra.mxu0 %v657_v7  ;;  %v675_v20 = vld [vmem:[#allocation2 + $0x88] ss:$16 sps:$4 sm:$0xff]   ;;  %v678_v21 = vld [vmem:[#allocation2 + $0x80] ss:$16 sps:$4 sm:$0xff]   ;;  %v679_v22 = vld [vmem:[#allocation2 + $0x64] ss:$16 sps:$4 sm:$0xff]   ;;  %v187_v7 = vlaneseq }
  0x16   :  { %495 = vmatprep.subr.bf16.mxu0 %v665_v11  ;;  %453 = vmatpush1.bf16.msra.mxu1 %v666_v13  ;;  %v683_v23 = vld [vmem:[#allocation2 + $0x6c] ss:$16 sps:$4 sm:$0xff]   ;;  %v681_v24 = vld [vmem:[#allocation2 + $0x68] ss:$16 sps:$4 sm:$0xff]   ;;  %v684_v25 = vld [vmem:[#allocation2 + $0x60] ss:$16 sps:$4 sm:$0xff]  }
  0x17   :  { %454 = vmatprep.subr.bf16.mxu1 %v667_v14  ;;  %v685_v26 = vld [vmem:[#allocation2 + $0x44] ss:$16 sps:$4 sm:$0xff]   ;;  %v689_v27 = vld [vmem:[#allocation2 + $0x4c] ss:$16 sps:$4 sm:$0xff]   ;;  %v687_v28 = vld [vmem:[#allocation2 + $0x48] ss:$16 sps:$4 sm:$0xff]  }
  0x18   :  { %v690_v29 = vld [vmem:[#allocation2 + $0x40] ss:$16 sps:$4 sm:$0xff]   ;;  %v691_v30 = vld [vmem:[#allocation2 + $0x24] ss:$16 sps:$4 sm:$0xff]   ;;  %v695_v31 = vld [vmem:[#allocation2 + $0x2c] ss:$16 sps:$4 sm:$0xff]  }
  0x19   :  { %496 = vmatpush1.bf16.msra.mxu0 %v663_v12  ;;  %v693_v32 = vld [vmem:[#allocation2 + $0x28] ss:$16 sps:$4 sm:$0xff]   ;;  %v696_v33 = vld [vmem:[#allocation2 + $0x20] ss:$16 sps:$4 sm:$0xff]   ;;  %v697_v34 = vld [vmem:[#allocation2 + $0x4] ss:$16 sps:$4 sm:$0xff]  }
  0x1a   :  { %497 = vmatprep.subr.bf16.mxu0 %v671_v15  ;;  %455 = vmatpush1.bf16.msra.mxu1 %v672_v17  ;;  %v701_v35 = vld [vmem:[#allocation2 + $0xc] ss:$16 sps:$4 sm:$0xff]   ;;  %v699_v36 = vld [vmem:[#allocation2 + $0x8] ss:$16 sps:$4 sm:$0xff]   ;;  %v702_v37 = vld [vmem:[#allocation2] ss:$16 sps:$4 sm:$0xff]  }
  0x1b   :  { %456 = vmatprep.subr.bf16.mxu1 %v673_v18  ;;  %v703_v38 = vld [vmem:[#allocation2 + $0x164] ss:$16 sps:$4 sm:$0xff]   ;;  %v707_v39 = vld [vmem:[#allocation2 + $0x16c] ss:$16 sps:$4 sm:$0xff]   ;;  %v705_v40 = vld [vmem:[#allocation2 + $0x168] ss:$16 sps:$4 sm:$0xff]  }
  0x1c   :  { %636 = vmatmul.mubr.msk.bf16.gmra.mxu0 %vm55_vm2, %v653_v4  ;;  %v708_v41 = vld [vmem:[#allocation2 + $0x160] ss:$16 sps:$4 sm:$0xff]   ;;  %v709_v42 = vld [vmem:[#allocation2 + $0x144] ss:$16 sps:$4 sm:$0xff]   ;;  %v713_v43 = vld [vmem:[#allocation2 + $0x14c] ss:$16 sps:$4 sm:$0xff]  }
  0x1d   :  { %639 = vmatprep.mubr.msk.bf16.mxu0 %vm775_vm0, %v774_v0  ;;  %498 = vmatpush1.bf16.msra.mxu0 %v669_v16  ;;  %v711_v44 = vld [vmem:[#allocation2 + $0x148] ss:$16 sps:$4 sm:$0xff]   ;;  %v714_v45 = vld [vmem:[#allocation2 + $0x140] ss:$16 sps:$4 sm:$0xff]   ;;  %v715_v46 = vld [vmem:[#allocation2 + $0x124] ss:$16 sps:$4 sm:$0xff]  }
  0x1e   :  { %499 = vmatprep.subr.bf16.mxu0 %v677_v19  ;;  %457 = vmatpush1.bf16.msra.mxu1 %v678_v21  ;;  %v719_v47 = vld [vmem:[#allocation2 + $0x12c] ss:$16 sps:$4 sm:$0xff]   ;;  %v717_v48 = vld [vmem:[#allocation2 + $0x128] ss:$16 sps:$4 sm:$0xff]   ;;  %v720_v49 = vld [vmem:[#allocation2 + $0x120] ss:$16 sps:$4 sm:$0xff]  }
  0x1f   :  { %458 = vmatprep.subr.bf16.mxu1 %v679_v22  ;;  %v721_v50 = vld [vmem:[#allocation2 + $0x104] ss:$16 sps:$4 sm:$0xff]   ;;  %v725_v51 = vld [vmem:[#allocation2 + $0x10c] ss:$16 sps:$4 sm:$0xff]   ;;  %v723_v52 = vld [vmem:[#allocation2 + $0x108] ss:$16 sps:$4 sm:$0xff]  }
  0x20   :  { %v726_v53 = vld [vmem:[#allocation2 + $0x100] ss:$16 sps:$4 sm:$0xff]   ;;  %v188_v8 = vshrl.u32 %v187_v7, 7 }
  0x21   :  { %500 = vmatpush1.bf16.msra.mxu0 %v675_v20  ;;  %v185_v11 = vld [vmem:[%s829_s3] sm:$0xf]  ;;  %s777_s3 = smov [#allocation5]  }
  0x22   :  { %501 = vmatprep.subr.bf16.mxu0 %v683_v23  ;;  %459 = vmatpush1.bf16.msra.mxu1 %v684_v25  ;;  %v189_v9 = vsub.s32 0, %v188_v8  ;;  %v197_v10 = vsub.s32 2, %v188_v8  ;;  %v193_v12 = vsub.s32 1, %v188_v8  ;;  %v201_v13 = vsub.s32 3, %v188_v8  ;;  %s557_s30 = sshll.u32 %s777_s3, 4  ;;  %s558_s30 = int_to_ptr.vmem [resolvable:$true] %s557_s30 }
  0x23   :  { %460 = vmatprep.subr.bf16.mxu1 %v685_v26  ;;  %s747_s5 = scalar_lea.vmem %s558_s30, 1024  ;;  %p752_p6 = scmp.lt.s32.totalorder %s558_s30, %s558_s30 }
  0x24   :  { %640 = vmatmul.mubr.msk.bf16.gmra.mxu0 %vm55_vm2, %v654_v5  ;;  %v190_v14 = vrot.slane %v185_v11, %v189_v9  ;;  %v198_v15 = vrot.slane %v185_v11, %v197_v10  ;;  %v194_v16 = vrot.slane %v185_v11, %v193_v12  ;;  %v202_v17 = vrot.slane %v185_v11, %v201_v13  ;;  %p748_p5 = scmp.ne.s32.totalorder %s558_s30, %s747_s5  ;;  %p753_p7 = scmp.lt.s32.totalorder %s747_s5, %s747_s5 }
  0x25   :  { %502 = vmatpush1.bf16.msra.mxu0 %v681_v24 }
  0x26   :  { %503 = vmatprep.subr.bf16.mxu0 %v689_v27  ;;  %461 = vmatpush1.bf16.msra.mxu1 %v690_v29  ;;  %p754_p8 = por %p753_p7, %p752_p6 }
  0x27   :  { %462 = vmatprep.subr.bf16.mxu1 %v691_v30 }
  0x28   :  { %p755_p9 = pnand %p754_p8, %p748_p5 }
  0x29   :  { %504 = vmatpush1.bf16.msra.mxu0 %v687_v28 }
  0x2a   :  { %505 = vmatprep.subr.bf16.mxu0 %v695_v31  ;;  %463 = vmatpush1.bf16.msra.mxu1 %v696_v33 }
  0x2b   :  { %464 = vmatprep.subr.bf16.mxu1 %v697_v34 }
  0x2d   :  { %506 = vmatpush1.bf16.msra.mxu0 %v693_v32 }
  0x2e   :  { %507 = vmatprep.subr.bf16.mxu0 %v701_v35  ;;  %465 = vmatpush1.bf16.msra.mxu1 %v702_v37 }
  0x2f   :  { %474 = vmatprep.subr.bf16.mxu1 %v703_v38 }
  0x31   :  { %508 = vmatpush1.bf16.msra.mxu0 %v699_v36 }
  0x32   :  { %517 = vmatprep.subr.bf16.mxu0 %v707_v39  ;;  %475 = vmatpush2.bf16.msra.mxu1 %v708_v41 }
  0x33   :  { %476 = vmatprep.subr.bf16.mxu1 %v709_v42 }
  0x35   :  { %518 = vmatpush2.bf16.msra.mxu0 %v705_v40 }
  0x36   :  { %519 = vmatprep.subr.bf16.mxu0 %v713_v43  ;;  %477 = vmatpush2.bf16.msra.mxu1 %v714_v45 }
  0x37   :  { %478 = vmatprep.subr.bf16.mxu1 %v715_v46 }
  0x39   :  { %520 = vmatpush2.bf16.msra.mxu0 %v711_v44 }
  0x3a   :  { %521 = vmatprep.subr.bf16.mxu0 %v719_v47  ;;  %479 = vmatpush2.bf16.msra.mxu1 %v720_v49 }
  0x3b   :  { %480 = vmatprep.subr.bf16.mxu1 %v721_v50 }
  0x3d   :  { %522 = vmatpush2.bf16.msra.mxu0 %v717_v48 }
  0x3e   :  { %523 = vmatprep.subr.bf16.mxu0 %v725_v51  ;;  %481 = vmatpush2.bf16.msra.mxu1 %v726_v53 }
  0x41   :  { %524 = vmatpush2.bf16.msra.mxu0 %v723_v52 }
  0xd4   :  { %v103_v54 = vpop.f32.mrf.mxu0 }
  0xd6   :  { %v633_v55 = vpop.f32.mrf.mxu0 }
  0xd8   :  { %v106_v56 = vpop.f32.mrf.mxu0 }
  0xd9   :  { %v126_v57 = vpack.c.bf16 %v106_v56, %v103_v54 }
  0xda   :  { %v634_v58 = vpop.f32.mrf.mxu0 }
  0xdc   :  { %v111_v59 = vpop.f32.mrf.mxu0 }
  0xde   :  { %v637_v60 = vpop.f32.mrf.mxu0 }
  0xe0   :  { %v114_v61 = vpop.f32.mrf.mxu0 }
  0xe1   :  { %v127_v62 = vpack.c.bf16 %v114_v61, %v111_v59 }
  0xe2   :  { %v638_v63 = vpop.f32.mrf.mxu0 }
  0xe3   :  { %130 = vrot.lane.b32.xlu0 %v127_v62, %s776_s0 }
  0xe4   :  { %v119_v0 = vpop.f32.mrf.mxu0 }
  0xe6   :  { %v641_v1 = vpop.f32.mrf.mxu0 }
  0xe8   :  { %v122_v2 = vpop.f32.mrf.mxu0 }
  0xe9   :  { %v128_v3 = vpack.c.bf16 %v122_v2, %v119_v0 }
  0xea   :  { %v642_v4 = vpop.f32.mrf.mxu0 }
  0xeb   :  { %623 = vmatprep.mubr.msk.bf16.mxu1 %vm132_vm3, %v128_v3  ;;  %624 = vmatprep.mubr.msk.bf16.mxu0 %vm132_vm3, %v128_v3 }
 0x155   :  { %v131_v5 = vpop.permute.xlu0 %130 }
 0x156   :  { %v135_v6 = vsel %vm132_vm3, %v126_v57, %v131_v5 }
 0x157   :  { %483 = vmatmul.mubr.bf16.vlgmr.msra.gmra.mxu1 %v135_v6  ;;  %526 = vmatmul.mubr.bf16.vlgmr.msra.gmra.mxu0 %v135_v6 }
 0x217   :  { %v484_v18 = vpop.f32.mrf.mxu1  ;;  %v527_v19 = vpop.f32.mrf.mxu0 }
 0x218   :  { %v485_v20 = vadd.f32 %v484_v18, %v190_v14  ;;  %v528_v21 = vadd.f32 %v527_v19, %v198_v15 }
 0x219   :  { %v486_v22 = vpop.f32.mrf.mxu1  ;;  %v529_v23 = vpop.f32.mrf.mxu0 }
 0x21a   :  { %v536_v24 = vmax.f32 %v485_v20, 0.0  ;;  %v538_v25 = vmax.f32 %v528_v21, 0.0  ;;  %v487_v26 = vadd.f32 %v486_v22, %v194_v16  ;;  %v530_v27 = vadd.f32 %v529_v23, %v202_v17 }
 0x21b   :  { %v488_v28 = vpop.f32.mrf.mxu1  ;;  %v531_v29 = vpop.f32.mrf.mxu0 }
 0x21c   :  { %544 = vst [vmem:[#allocation5] sm:$0xff] %v536_v24  ;;  %546 = vst [vmem:[#allocation5 + $0x10] sm:$0xff] %v538_v25  ;;  %v537_v30 = vmax.f32 %v487_v26, 0.0  ;;  %v539_v31 = vmax.f32 %v530_v27, 0.0  ;;  %v489_v32 = vadd.f32 %v488_v28, %v190_v14  ;;  %v532_v33 = vadd.f32 %v531_v29, %v198_v15 }
 0x21d   :  { %v490_v34 = vpop.f32.mrf.mxu1  ;;  %v533_v35 = vpop.f32.mrf.mxu0 }
 0x21e   :  { %545 = vst [vmem:[#allocation5 + $0x8] sm:$0xff] %v537_v30  ;;  %547 = vst [vmem:[#allocation5 + $0x18] sm:$0xff] %v539_v31  ;;  %v540_v36 = vmax.f32 %v489_v32, 0.0  ;;  %v542_v37 = vmax.f32 %v532_v33, 0.0  ;;  %v491_v38 = vadd.f32 %v490_v34, %v194_v16  ;;  %v534_v39 = vadd.f32 %v533_v35, %v202_v17 }
 0x220   :  { %548 = vst [vmem:[#allocation5 + $0x20] sm:$0xff] %v540_v36  ;;  %550 = vst [vmem:[#allocation5 + $0x30] sm:$0xff] %v542_v37  ;;  %v541_v40 = vmax.f32 %v491_v38, 0.0  ;;  %v543_v41 = vmax.f32 %v534_v39, 0.0 }
 0x222   :  { %549 = vst [vmem:[#allocation5 + $0x28] sm:$0xff] %v541_v40  ;;  %551 = vst [vmem:[#allocation5 + $0x38] sm:$0xff] %v543_v41 }
 0x223   :  { %758 = shalt.err (!%p755_p9)
}
 0x224   :  { %s778_s6 = smov 512   ;;  %s779_s7 = smov 32  }
 0x225   :  { %563 = dma.vmem_to_hbm [thread:$0]  %s558_s30, 1024, %s830_s4, [#allocation4], %s778_s6, %s778_s6, %s779_s7  }
 0x226   :  { %769 = dma.done.wait [#allocation4], 1024  }
 0x227   :  { %770 = vsyncadd [#allocation4], 4294966272 }
 0x228   :  { %567 = vsyncpa [#allocation3], 1 }
 0x229   :  { %568 = vsyncpa [#allocation4], 1 }

</bundles_post_ra>
